<compile_context>
chip_gen: v6e
topology: v6e:2x2x1
jax: 0.10.0
libtpu: 0.0.40
codegen_flags: <defaults>
</compile_context>

<pallas_src>
import functools

import jax
import jax.numpy as jnp
import numpy as np
from jax.experimental import pallas as pl
from jax.experimental.pallas import tpu as pltpu

LANE = 128  # vreg lane width: channel / contraction dims are padded to a multiple of this


def _round_up(x, m):
    return (x + m - 1) // m * m


def _pick_tile(dim, candidates=(512, 256, 128)):
    """Largest tile from `candidates` that divides `dim` (dim is a multiple of 128)."""
    for c in candidates:
        if c <= dim and dim % c == 0:
            return c
    return dim


def _row_tiling(h):
    """Output-row tile size th and padded row count Ht (multiple of th, >= h)."""
    h8 = _round_up(h, 8)
    for th in (32, 16, 8):
        if h8 % th == 0 and h8 // th >= 2:
            return th, h8
    return h8, h8


# -------------------- kernel 1: whole-K matmul + fused ReLU ---------------------
# Used for conv1 when stride != 1 (im2col path).  K stays whole: no K grid axis, no
# accumulator scratch, and the weight block is M-tile invariant (VMEM resident).


def _matmul_relu_kernel(a_ref, b_ref, o_ref):
    acc = jnp.dot(a_ref[...], b_ref[...], preferred_element_type=jnp.float32)
    o_ref[...] = jnp.maximum(acc, 0.0).astype(o_ref.dtype)


def pallas_matmul_relu(a, b, out_dtype=jnp.bfloat16):
    M, K = a.shape
    K2, N = b.shape
    assert K == K2 and K % LANE == 0 and N % LANE == 0, (a.shape, b.shape)
    Mp = _round_up(M, LANE)
    if Mp != M:
        a = jnp.pad(a, ((0, Mp - M), (0, 0)))
    tm = _pick_tile(Mp)
    tn = _pick_tile(N, (256, 128))

    out = pl.pallas_call(
        _matmul_relu_kernel,
        out_shape=jax.ShapeDtypeStruct((Mp, N), out_dtype),
        grid=(Mp // tm, N // tn),
        in_specs=[
            pl.BlockSpec((tm, K), lambda i, j: (i, 0)),
            # weight index_map independent of i -> weight stays VMEM-resident
            pl.BlockSpec((K, tn), lambda i, j: (0, j)),
        ],
        out_specs=pl.BlockSpec((tm, tn), lambda i, j: (i, j)),
        compiler_params=pltpu.CompilerParams(
            dimension_semantics=("parallel", "parallel")),
    )(a, b)
    return out[:M] if Mp != M else out


# --------- kernel 2: fused 3x3 (s=1) tap-conv (+ residual / downsample) + ReLU ---------


def _conv3x3_kernel(*refs, th, Wo, has_res, has_ds, relu):
    """One (batch b, row-tile r) step.

    x_hbm  : (B, Ht+2, Wo+2, Cin)   padded input, HBM (pl.ANY), manual halo DMA
    w_ref  : (9, Cin, Cout)         tap weights, bf16, VMEM resident
    res_ref: (1, th, Wo, Cres)      residual tile (optional)
    wd_ref : (Cres, Cout)           1x1 downsample weight (optional)
    o_ref  : (1, th, Wo, Cout)      lane-dense output tile
    xbuf   : (2, th+2, Wo+2, Cin)   VMEM double buffer for the halo'd input tile
    sem    : DMA semaphores (2,)
    """
    if has_ds:
        x_hbm, w_ref, res_ref, wd_ref, o_ref, xbuf, sem = refs
    elif has_res:
        x_hbm, w_ref, res_ref, o_ref, xbuf, sem = refs
        wd_ref = None
    else:
        x_hbm, w_ref, o_ref, xbuf, sem = refs
        res_ref = wd_ref = None

    b = pl.program_id(0)
    r = pl.program_id(1)
    nr = pl.num_programs(1)
    slot = r % 2
    cin = xbuf.shape[-1]
    cout = o_ref.shape[-1]

    def fetch(row_tile, sl):
        pltpu.make_async_copy(
            x_hbm.at[b, pl.ds(row_tile * th, th + 2)],   # th rows + 2-row halo
            xbuf.at[sl], sem.at[sl]).start()

    @pl.when(r == 0)                       # cold start of this image's row pipeline
    def _():
        fetch(0, 0)

    pltpu.make_async_copy(                 # wait for the current row tile
        x_hbm.at[b, pl.ds(r * th, th + 2)], xbuf.at[slot], sem.at[slot]).wait()

    @pl.when(r + 1 < nr)                   # prefetch the next row tile (same image)
    def _():
        fetch(r + 1, 1 - slot)

    # 9 taps, each a (th*Wo, Cin) @ (Cin, Cout) MXU matmul; the accumulator is a small
    # per-tile fp32 value that stays vreg-resident across the unrolled taps.
    x_view = xbuf.at[slot]
    acc = jnp.zeros((th * Wo, cout), jnp.float32)
    for dy in range(3):
        for dx in range(3):
            patch = x_view[dy:dy + th, dx:dx + Wo, :].reshape(th * Wo, cin)
            acc += jnp.dot(patch, w_ref[dy * 3 + dx],
                           preferred_element_type=jnp.float32)

    if has_res:
        res = res_ref[0].reshape(th * Wo, res_ref.shape[-1])
        if has_ds:
            res = jnp.dot(res, wd_ref[...], preferred_element_type=jnp.float32)
        acc = acc + res.astype(jnp.float32)
    if relu:
        acc = jnp.maximum(acc, 0.0)
    o_ref[...] = acc.reshape(o_ref.shape).astype(o_ref.dtype)


def pallas_conv3x3_s1(x, w_taps, *, res=None, wd=None, relu=True,
                      out_dtype=jnp.float32):
    """relu?(conv3x3_s1_p1(x, w) [+ residual (optionally @ wd)]) with spatial row tiling.

    x      : (B, H, W, Cin)  bf16, channels already lane-padded
    w_taps : (9, Cin, Cout)  bf16
    res    : (B, H, W, Cres) residual input (optional); wd: (Cres, Cout) (optional)
    """
    B, H, W, Cin = x.shape
    Cout = w_taps.shape[-1]
    th, Ht = _row_tiling(H)
    x_pad = jnp.pad(x, ((0, 0), (1, 1 + Ht - H), (1, 1), (0, 0)))   # 1x, no inflation

    has_res = res is not None
    has_ds = wd is not None
    if has_res and Ht != H:
        res = jnp.pad(res, ((0, 0), (0, Ht - H), (0, 0), (0, 0)))

    in_specs = [pl.BlockSpec(memory_space=pl.ANY),                       # manual halo DMA
                pl.BlockSpec(w_taps.shape, lambda b, r: (0, 0, 0))]      # VMEM resident
    args = [x_pad, w_taps]
    if has_res:
        in_specs.append(pl.BlockSpec((1, th, W, res.shape[-1]),
                                     lambda b, r: (b, r, 0, 0)))
        args.append(res)
    if has_ds:
        in_specs.append(pl.BlockSpec(wd.shape, lambda b, r: (0, 0)))     # VMEM resident
        args.append(wd)

    kernel = functools.partial(_conv3x3_kernel, th=th, Wo=W,
                               has_res=has_res, has_ds=has_ds, relu=relu)
    return pl.pallas_call(
        kernel,
        out_shape=jax.ShapeDtypeStruct((B, Ht, W, Cout), out_dtype),
        grid=(B, Ht // th),
        in_specs=in_specs,
        out_specs=pl.BlockSpec((1, th, W, Cout), lambda b, r: (b, r, 0, 0)),
        scratch_shapes=[pltpu.VMEM((2, th + 2, W + 2, Cin), x.dtype),
                        pltpu.SemaphoreType.DMA((2,))],
        compiler_params=pltpu.CompilerParams(
            dimension_semantics=("parallel", "arbitrary")),
    )(*args)


# --------------------------------- JAX glue -----------------------------------


def _im2col_compact(x, k, stride, pad, k_target):
    """NHWC -> (N*Ho*Wo, k_target) bf16; feature order (dy, dx, c) over the ORIGINAL
    cin, with the concatenated 9*cin dim padded once to k_target (compact K)."""
    N, H, W, C = x.shape
    xp = jnp.pad(x, ((0, 0), (pad, pad), (pad, pad), (0, 0)))
    Ho = (H + 2 * pad - k) // stride + 1
    Wo = (W + 2 * pad - k) // stride + 1
    cols = [xp[:, dy:dy + stride * (Ho - 1) + 1:stride,
               dx:dx + stride * (Wo - 1) + 1:stride, :]
            for dy in range(k) for dx in range(k)]
    cols = jnp.concatenate(cols, axis=-1).reshape(N * Ho * Wo, k * k * C)
    cols = jnp.pad(cols, ((0, 0), (0, k_target - k * k * C)))
    return cols.astype(jnp.bfloat16), Ho, Wo


def init_residual_block(key, in_channels, out_channels, stride):
    """Kaiming-normal (fan_out, relu) init in PyTorch OIHW layout (mirrors the nn.Module)."""
    k1, k2, k3 = jax.random.split(key, 3)

    def kaiming(k, shape):
        cout, _, kh, kw = shape
        fan_out = cout * kh * kw
        std = (2.0 / fan_out) ** 0.5
        return std * jax.random.normal(k, shape, dtype=jnp.float32)

    params = {
        "conv1": kaiming(k1, (out_channels, in_channels, 3, 3)),
        "conv2": kaiming(k2, (out_channels, out_channels, 3, 3)),
    }
    if stride != 1 or in_channels != out_channels:
        params["downsample"] = kaiming(k3, (out_channels, in_channels, 1, 1))
    return params


def prepare_pallas_params(params, stride):
    """One-time (hoisted) weight packing: OIHW -> lane-padded, transposed, bf16 operands."""
    cout, cin = params["conv1"].shape[:2]
    cin_p, cout_p = _round_up(cin, LANE), _round_up(cout, LANE)

    def taps(w, ci_p, co_p):
        co, ci, kh, kw = w.shape
        wt = jnp.transpose(w, (2, 3, 1, 0))                              # (kh,kw,Ci,Co)
        wt = jnp.pad(wt, ((0, 0), (0, 0), (0, ci_p - ci), (0, co_p - co)))
        return wt.reshape(kh * kw, ci_p, co_p).astype(jnp.bfloat16)

    prepared = {"cin": cin, "cout": cout, "cin_p": cin_p, "cout_p": cout_p}
    prepared["w2_taps"] = taps(params["conv2"], cout_p, cout_p)          # (9, Cp, Cp)

    if stride == 1:
        prepared["w1_taps"] = taps(params["conv1"], cin_p, cout_p)
    else:
        k1 = _round_up(9 * cin, LANE)   # compact K: pad the concatenated dim, not per tap
        w1 = jnp.transpose(params["conv1"], (2, 3, 1, 0)).reshape(9 * cin, cout)
        prepared["w1_mat"] = jnp.pad(
            w1, ((0, k1 - 9 * cin), (0, cout_p - cout))).astype(jnp.bfloat16)
        prepared["k1"] = k1

    if "downsample" in params:
        wd = jnp.transpose(params["downsample"], (2, 3, 1, 0))[0, 0]     # (cin, cout)
        prepared["wd_mat"] = jnp.pad(
            wd, ((0, cin_p - cin), (0, cout_p - cout))).astype(jnp.bfloat16)
    return prepared


def residual_block_forward(prepared, x_nchw, stride):
    x = jnp.transpose(x_nchw, (0, 2, 3, 1)).astype(jnp.float32)          # NCHW -> NHWC
    B, H, W, cin = x.shape
    cin_p, cout_p, cout = prepared["cin_p"], prepared["cout_p"], prepared["cout"]

    # lane-padded bf16 activations (MXU operand / residual input) -- half the DMA bytes
    x_lane = jnp.pad(x, ((0, 0), (0, 0), (0, 0), (0, cin_p - cin))).astype(jnp.bfloat16)

    # ---- conv1 (3x3, stride, pad=1) + ReLU ----
    if stride == 1:
        out1 = pallas_conv3x3_s1(x_lane, prepared["w1_taps"],
                                 relu=True, out_dtype=jnp.bfloat16)[:, :H]
        Ho, Wo = H, W
    else:
        # TODO(synk): stride-2 still uses an XLA im2col (only 9/stride^2 = 2.25x inflation
        # here); an in-kernel strided-tap variant would remove it entirely.
        a1, Ho, Wo = _im2col_compact(x, 3, stride, 1, prepared["k1"])
        out1 = pallas_matmul_relu(a1, prepared["w1_mat"], out_dtype=jnp.bfloat16)
        out1 = out1[:B * Ho * Wo].reshape(B, Ho, Wo, cout_p)

    # ---- residual path ----
    if "wd_mat" in prepared:
        res, wd = x_lane[:, ::stride, ::stride, :], prepared["wd_mat"]   # 1x1 fused below
    else:
        res, wd = x_lane, None                                           # identity

    # ---- conv2 (3x3, s=1, pad=1) + residual (+ downsample) + ReLU: fused tap kernel ----
    out = pallas_conv3x3_s1(out1, prepared["w2_taps"], res=res, wd=wd,
                            relu=True, out_dtype=jnp.float32)
    out = out[:, :Ho, :, :cout]                                          # drop padding
    return jnp.transpose(out, (0, 3, 1, 2))                              # NHWC -> NCHW


# ------------------------- pure-JAX reference (check) --------------------------


def _ref_forward(params, x, stride):
    def conv(x, w, s, pad):
        return jax.lax.conv_general_dilated(
            x, w, (s, s), ((pad, pad), (pad, pad)),
            dimension_numbers=("NCHW", "OIHW", "NCHW"),
        )

    residual = conv(x, params["downsample"], stride, 0) if "downsample" in params else x
    out = jax.nn.relu(conv(x, params["conv1"], stride, 1))
    out = conv(out, params["conv2"], 1, 1)
    return jax.nn.relu(out + residual)


# ----------------------------------- main ---------------------------------------

if __name__ == "__main__":
    key = jax.random.PRNGKey(0)
    kx, kp, kx2, kp2 = jax.random.split(key, 4)

    # Case 1: downsample path (stride=2, 4 -> 8 channels), input NCHW = (2, 4, 16, 16)
    in_c, out_c, stride = 4, 8, 2
    x = jax.random.normal(kx, (2, in_c, 16, 16), dtype=jnp.float32)
    params = init_residual_block(kp, in_c, out_c, stride)
    prepared = prepare_pallas_params(params, stride)

    out = jax.block_until_ready(residual_block_forward(prepared, x, stride))
    ref = jax.block_until_ready(_ref_forward(params, x, stride))
    assert out.shape == ref.shape, (out.shape, ref.shape)
    assert np.allclose(np.asarray(out), np.asarray(ref), atol=5e-2, rtol=5e-2), (
        "max|diff|=%g" % float(np.max(np.abs(np.asarray(out) - np.asarray(ref)))))

    # Case 2: identity-residual path (stride=1, in==out channels)
    in2, out2, s2 = 8, 8, 1
    x2 = jax.random.normal(kx2, (2, in2, 16, 16), dtype=jnp.float32)
    params2 = init_residual_block(kp2, in2, out2, s2)
    prepared2 = prepare_pallas_params(params2, s2)

    o2 = jax.block_until_ready(residual_block_forward(prepared2, x2, s2))
    r2 = jax.block_until_ready(_ref_forward(params2, x2, s2))
    assert o2.shape == r2.shape, (o2.shape, r2.shape)
    assert np.allclose(np.asarray(o2), np.asarray(r2), atol=5e-2, rtol=5e-2), (
        "max|diff|=%g" % float(np.max(np.abs(np.asarray(o2) - np.asarray(r2)))))

    print("KERNEL_OK")
</pallas_src>

<mosaic_0001>
module attributes {stable_mosaic.version = 11 : i64} {
  func.func @_matmul_relu_kernel(%arg0: i32, %arg1: i32, %arg2: memref<128x128xbf16, #tpu.memory_space<vmem>>, %arg3: memref<128x128xbf16, #tpu.memory_space<vmem>>, %arg4: memref<128x128xbf16, #tpu.memory_space<vmem>>) attributes {dimension_semantics = [#tpu.dimension_semantics<parallel>, #tpu.dimension_semantics<parallel>], iteration_bounds = array<i64: 1, 1>, scalar_prefetch = 0 : i64, scratch_operands = 0 : i64, tpu.core_type = #tpu.core_type<tc>, window_params = [{transform_indices = @transform_0, window_bounds = array<i64: 128, 128>}, {transform_indices = @transform_1, window_bounds = array<i64: 128, 128>}, {transform_indices = @transform_2, window_bounds = array<i64: 128, 128>}]} {
    %c0 = arith.constant 0 : index
    %c0_0 = arith.constant 0 : index
    %0 = vector.load %arg2[%c0, %c0_0] : memref<128x128xbf16, #tpu.memory_space<vmem>>, vector<128x128xbf16>
    %c0_1 = arith.constant 0 : index
    %c0_2 = arith.constant 0 : index
    %1 = vector.load %arg3[%c0_1, %c0_2] : memref<128x128xbf16, #tpu.memory_space<vmem>>, vector<128x128xbf16>
    %cst = arith.constant dense<0.000000e+00> : vector<128x128xf32>
    %2 = tpu.matmul %0, %1, %cst {dimension_numbers = #tpu.dot_dimension_numbers<[1], [0], [0], [1], [0, 0, 1, 1], [], []>} : vector<128x128xbf16>, vector<128x128xbf16>, vector<128x128xf32> -> vector<128x128xf32>
    %cst_3 = arith.constant 0.000000e+00 : f32
    %3 = vector.broadcast %cst_3 : f32 to vector<128x128xf32>
    %4 = arith.maximumf %2, %3 : vector<128x128xf32>
    %5 = arith.truncf %4 : vector<128x128xf32> to vector<128x128xbf16>
    %c0_4 = arith.constant 0 : index
    %c0_5 = arith.constant 0 : index
    %6 = vector.load %arg4[%c0_4, %c0_5] : memref<128x128xbf16, #tpu.memory_space<vmem>>, vector<128x128xbf16>
    tpu.vector_store %arg4[%c0_4, %c0_5], %5 {strides = array<i32>} : memref<128x128xbf16, #tpu.memory_space<vmem>>, vector<128x128xbf16>,
    return
  }
  func.func @transform_0(%arg0: i32, %arg1: i32) -> (i32, i32) {
    %c0_i32 = arith.constant 0 : i32
    %c0_i32_0 = arith.constant 0 : i32
    return %arg0, %c0_i32 : i32, i32
  }
  func.func @transform_1(%arg0: i32, %arg1: i32) -> (i32, i32) {
    %c0_i32 = arith.constant 0 : i32
    %c0_i32_0 = arith.constant 0 : i32
    return %c0_i32, %arg1 : i32, i32
  }
  func.func @transform_2(%arg0: i32, %arg1: i32) -> (i32, i32) {
    %c0_i32 = arith.constant 0 : i32
    return %arg0, %arg1 : i32, i32
  }
}

</mosaic_0001>

<bundles_post_ra>
// kernel: tpu_custom_call.1
= control target key start
LH: loop header
LB: loop body
LE: loop exit
PB: predicated region body
PF: predicated region fallthrough
CT: control target
= control target key end

     0   :  { %7 = vsyncpa [#allocation3], 0  ;;  %s664_s0 = inlined_call_operand.hbm [shape: bf16[128,128], index: 0, kind: input, shape index: {}]   ;;  %s665_s1 = inlined_call_operand.hbm [shape: bf16[128,128], index: 1, kind: input, shape index: {}]   ;;  %s666_s2 = inlined_call_operand.hbm [shape: bf16[128,128], index: 2, kind: output, shape index: {}]  }
   0x1   :  { %8 = vsyncpa [#allocation6], 0 }
   0x2   :  { %9 = vsyncpa [#allocation4], 0  ;;  %s626_s9 = smov [#allocation2]  }
   0x3   :  { %s15_s10 = sshll.u32 %s626_s9, 4  ;;  %s16_s10 = int_to_ptr.vmem [resolvable:$true] %s15_s10 }
   0x4   :  { %s568_s11 = scalar_lea.vmem %s16_s10, 1024  ;;  %p573_p1 = scmp.lt.s32.totalorder %s16_s10, %s16_s10 }
   0x5   :  { %p569_p0 = scmp.ne.s32.totalorder %s16_s10, %s568_s11  ;;  %p574_p2 = scmp.lt.s32.totalorder %s568_s11, %s568_s11 }
   0x7   :  { %p575_p3 = por %p574_p2, %p573_p1 }
   0x9   :  { %p576_p4 = pnand %p575_p3, %p569_p0 }
   0xb   :  { %579 = shalt.err (!%p576_p4)
}
   0xc   :  { %s627_s12 = smov 64   ;;  %s628_s13 = smov 4  }
   0xd   :  { %21 = dma.hbm_to_vmem [thread:$0]  %s664_s0, 1024, %s16_s10, [#allocation3], %s627_s12, %s627_s12, %s628_s13  }
   0xe   :  { %s629_s16 = smov [#allocation5]  }
   0xf   :  { %s27_s17 = sshll.u32 %s629_s16, 4  ;;  %s28_s17 = int_to_ptr.vmem [resolvable:$true] %s27_s17 }
  0x10   :  { %s588_s18 = scalar_lea.vmem %s28_s17, 1024  ;;  %p593_p6 = scmp.lt.s32.totalorder %s28_s17, %s28_s17 }
  0x11   :  { %p589_p5 = scmp.ne.s32.totalorder %s28_s17, %s588_s18  ;;  %p594_p7 = scmp.lt.s32.totalorder %s588_s18, %s588_s18 }
  0x13   :  { %p595_p8 = por %p594_p7, %p593_p6 }
  0x15   :  { %p596_p9 = pnand %p595_p8, %p589_p5 }
  0x17   :  { %599 = shalt.err (!%p596_p9)
}
  0x18   :  { %33 = dma.hbm_to_vmem [thread:$0]  %s665_s1, 1024, %s28_s17, [#allocation6], %s627_s12, %s627_s12, %s628_s13  }
  0x19   :  { %620 = dma.done.wait [#allocation3], 1024  }
  0x1a   :  { %621 = vsyncadd [#allocation3], 4294966272 }
  0x1b   :  { %622 = dma.done.wait [#allocation6], 1024  }
  0x1c   :  { %623 = vsyncadd [#allocation6], 4294966272  ;;  %v544_v0 = vld [vmem:[#allocation5 + $0x38] sm:$0xff]   ;;  %v545_v1 = vld [vmem:[#allocation5 + $0x30] sm:$0xff]   ;;  %s630_s0 = smov [#allocation7]  }
  0x1d   :  { %491 = vmatprep.subr.bf16.mxu0 %v544_v0  ;;  %523 = vmatprep.subr.bf16.mxu1 %v544_v0  ;;  %v546_v2 = vld [vmem:[#allocation5 + $0x28] sm:$0xff]   ;;  %v547_v3 = vld [vmem:[#allocation5 + $0x20] sm:$0xff]   ;;  %v548_v6 = vld [vmem:[#allocation5 + $0x18] sm:$0xff]   ;;  %s367_s1 = sshll.u32 %s630_s0, 4  ;;  %s368_s1 = int_to_ptr.vmem [resolvable:$true] %s367_s1 }
  0x1e   :  { %492 = vmatpush3.bf16.msra.mxu0 %v544_v0  ;;  %531 = vmatpush3.bf16.msra.mxu1 %v544_v0  ;;  %v552_v4 = vld [vmem:[#allocation2] sm:$0xff]   ;;  %v549_v7 = vld [vmem:[#allocation5 + $0x10] sm:$0xff]   ;;  %v550_v8 = vld [vmem:[#allocation5 + $0x8] sm:$0xff]   ;;  %s600_s21 = scalar_lea.vmem %s368_s1, 1024  ;;  %p605_p11 = scmp.lt.s32.totalorder %s368_s1, %s368_s1 }
  0x1f   :  { %493 = vmatprep.subr.bf16.mxu0 %v545_v1  ;;  %524 = vmatprep.subr.bf16.mxu1 %v545_v1  ;;  %v553_v5 = vld [vmem:[#allocation2 + $0x20] sm:$0xff]   ;;  %v554_v10 = vld [vmem:[#allocation2 + $0x8] sm:$0xff]   ;;  %v556_v12 = vld [vmem:[#allocation2 + $0x10] sm:$0xff]   ;;  %p601_p10 = scmp.ne.s32.totalorder %s368_s1, %s600_s21  ;;  %p606_p12 = scmp.lt.s32.totalorder %s600_s21, %s600_s21 }
  0x20   :  { %507 = vmatprep.mubr.bf16.mxu0 %v552_v4  ;;  %515 = vmatprep.mubr.bf16.mxu1 %v553_v5  ;;  %v551_v9 = vld [vmem:[#allocation5] sm:$0xff]   ;;  %v555_v11 = vld [vmem:[#allocation2 + $0x28] sm:$0xff]   ;;  %v557_v13 = vld [vmem:[#allocation2 + $0x30] sm:$0xff]  }
  0x21   :  { %v558_v14 = vld [vmem:[#allocation2 + $0x18] sm:$0xff]   ;;  %p607_p13 = por %p606_p12, %p605_p11 }
  0x22   :  { %494 = vmatpush3.bf16.msra.mxu0 %v545_v1  ;;  %532 = vmatpush3.bf16.msra.mxu1 %v545_v1  ;;  %v559_v15 = vld [vmem:[#allocation2 + $0x38] sm:$0xff]  }
  0x23   :  { %495 = vmatprep.subr.bf16.mxu0 %v546_v2  ;;  %525 = vmatprep.subr.bf16.mxu1 %v546_v2  ;;  %p608_p0 = pnand %p607_p13, %p601_p10 }
  0x26   :  { %496 = vmatpush3.bf16.msra.mxu0 %v546_v2  ;;  %533 = vmatpush3.bf16.msra.mxu1 %v546_v2 }
  0x27   :  { %497 = vmatprep.subr.bf16.mxu0 %v547_v3  ;;  %526 = vmatprep.subr.bf16.mxu1 %v547_v3 }
  0x2a   :  { %498 = vmatpush3.bf16.msra.mxu0 %v547_v3  ;;  %534 = vmatpush3.bf16.msra.mxu1 %v547_v3 }
  0x2b   :  { %499 = vmatprep.subr.bf16.mxu0 %v548_v6  ;;  %527 = vmatprep.subr.bf16.mxu1 %v548_v6 }
  0x2e   :  { %500 = vmatpush3.bf16.msra.mxu0 %v548_v6  ;;  %535 = vmatpush3.bf16.msra.mxu1 %v548_v6 }
  0x2f   :  { %501 = vmatprep.subr.bf16.mxu0 %v549_v7  ;;  %528 = vmatprep.subr.bf16.mxu1 %v549_v7 }
  0x32   :  { %502 = vmatpush3.bf16.msra.mxu0 %v549_v7  ;;  %536 = vmatpush3.bf16.msra.mxu1 %v549_v7 }
  0x33   :  { %503 = vmatprep.subr.bf16.mxu0 %v550_v8  ;;  %529 = vmatprep.subr.bf16.mxu1 %v550_v8 }
  0x36   :  { %504 = vmatpush3.bf16.msra.mxu0 %v550_v8  ;;  %537 = vmatpush3.bf16.msra.mxu1 %v550_v8 }
  0x37   :  { %505 = vmatprep.subr.bf16.mxu0 %v551_v9  ;;  %530 = vmatprep.subr.bf16.mxu1 %v551_v9 }
  0x3a   :  { %506 = vmatpush3.bf16.msra.mxu0 %v551_v9  ;;  %538 = vmatpush3.bf16.msra.mxu1 %v551_v9 }
  0x3d   :  { %508 = vmatmul.mubr.bf16.vlgmr.msra.gmra.mxu0 %v554_v10  ;;  %516 = vmatmul.mubr.bf16.vlgmr.msra.gmra.mxu1 %v555_v11 }
  0x3e   :  { %511 = vmatprep.mubr.bf16.mxu0 %v556_v12  ;;  %519 = vmatprep.mubr.bf16.mxu1 %v557_v13 }
  0x45   :  { %512 = vmatmul.mubr.bf16.gmra.mxu0 %v558_v14  ;;  %520 = vmatmul.mubr.bf16.gmra.mxu1 %v559_v15 }
  0xfd   :  { %v509_v16 = vpop.f32.mrf.mxu0  ;;  %v517_v17 = vpop.f32.mrf.mxu1 }
  0xfe   :  { %v268_v22 = vmax.f32 %v509_v16, 0.0  ;;  %v276_v23 = vmax.f32 %v517_v17, 0.0 }
  0xff   :  { %v203_v18 = vpop.f32.mrf.mxu0  ;;  %v235_v19 = vpop.f32.mrf.mxu1 }
 0x100   :  { %v266_v26 = vmax.f32 %v203_v18, 0.0  ;;  %v274_v27 = vmax.f32 %v235_v19, 0.0 }
 0x101   :  { %v510_v20 = vpop.f32.mrf.mxu0  ;;  %v518_v21 = vpop.f32.mrf.mxu1 }
 0x102   :  { %v269_v24 = vmax.f32 %v510_v20, 0.0  ;;  %v277_v25 = vmax.f32 %v518_v21, 0.0 }
 0x103   :  { %v206_v28 = vpop.f32.mrf.mxu0  ;;  %v238_v29 = vpop.f32.mrf.mxu1 }
 0x104   :  { %v436_v30 = vpack.c.bf16 %v269_v24, %v268_v22  ;;  %v456_v31 = vpack.c.bf16 %v277_v25, %v276_v23  ;;  %v267_v32 = vmax.f32 %v206_v28, 0.0  ;;  %v275_v33 = vmax.f32 %v238_v29, 0.0 }
 0x105   :  { %v513_v34 = vpop.f32.mrf.mxu0  ;;  %v521_v35 = vpop.f32.mrf.mxu1 }
 0x106   :  { %468 = vst [vmem:[#allocation7 + $0x8] sm:$0xff] %v436_v30   ;;  %472 = vst [vmem:[#allocation7 + $0x28] sm:$0xff] %v456_v31   ;;  %v431_v36 = vpack.c.bf16 %v267_v32, %v266_v26  ;;  %v451_v37 = vpack.c.bf16 %v275_v33, %v274_v27  ;;  %v272_v42 = vmax.f32 %v513_v34, 0.0  ;;  %v280_v43 = vmax.f32 %v521_v35, 0.0 }
 0x107   :  { %v219_v38 = vpop.f32.mrf.mxu0  ;;  %v251_v39 = vpop.f32.mrf.mxu1 }
 0x108   :  { %432 = vst [vmem:[#allocation7] sm:$0xff] %v431_v36   ;;  %471 = vst [vmem:[#allocation7 + $0x20] sm:$0xff] %v451_v37   ;;  %v270_v46 = vmax.f32 %v219_v38, 0.0  ;;  %v278_v47 = vmax.f32 %v251_v39, 0.0 }
 0x109   :  { %v514_v40 = vpop.f32.mrf.mxu0  ;;  %v522_v41 = vpop.f32.mrf.mxu1 }
 0x10a   :  { %v273_v44 = vmax.f32 %v514_v40, 0.0  ;;  %v281_v45 = vmax.f32 %v522_v41, 0.0 }
 0x10b   :  { %v222_v48 = vpop.f32.mrf.mxu0  ;;  %v254_v49 = vpop.f32.mrf.mxu1 }
 0x10c   :  { %v446_v50 = vpack.c.bf16 %v273_v44, %v272_v42  ;;  %v466_v51 = vpack.c.bf16 %v281_v45, %v280_v43  ;;  %v271_v52 = vmax.f32 %v222_v48, 0.0  ;;  %v279_v53 = vmax.f32 %v254_v49, 0.0 }
 0x10e   :  { %470 = vst [vmem:[#allocation7 + $0x18] sm:$0xff] %v446_v50   ;;  %474 = vst [vmem:[#allocation7 + $0x38] sm:$0xff] %v466_v51   ;;  %v441_v54 = vpack.c.bf16 %v271_v52, %v270_v46  ;;  %v461_v55 = vpack.c.bf16 %v279_v53, %v278_v47 }
 0x110   :  { %469 = vst [vmem:[#allocation7 + $0x10] sm:$0xff] %v441_v54   ;;  %473 = vst [vmem:[#allocation7 + $0x30] sm:$0xff] %v461_v55  }
 0x111   :  { %611 = shalt.err (!%p608_p0)
}
 0x112   :  { %373 = dma.vmem_to_hbm [thread:$0]  %s368_s1, 1024, %s666_s2, [#allocation4], %s627_s12, %s627_s12, %s628_s13  }
 0x113   :  { %624 = dma.done.wait [#allocation4], 1024  }
 0x114   :  { %625 = vsyncadd [#allocation4], 4294966272 }
 0x115   :  { %377 = vsyncpa [#allocation3], 1 }
 0x116   :  { %378 = vsyncpa [#allocation6], 1 }
 0x117   :  { %379 = vsyncpa [#allocation4], 1 }

</bundles_post_ra>
